<compile_context>
chip_gen: v7x
topology: tpu7x:2x2x1
jax: 0.10.0
libtpu: 0.0.40
codegen_flags: <defaults>
</compile_context>

<pallas_src>
import numpy as np
import jax
import jax.numpy as jnp
from jax.experimental import pallas as pl
from jax.experimental.pallas import tpu as pltpu  # noqa: F401  (TPU tuning hooks)


# ----------------------------- configuration --------------------------------
BATCH = 2
LATENT_DIM = 16
CHANNELS = 8
N_SAMPLES = 4096                      # small stand-in for the original 32768
N_FILTER_BANDS = 16                   # unused by forward (as in the module)
ENCODING_CHANNELS = 8                 # unused by forward (as in the module)

N_FRAMES = N_SAMPLES // 256           # 16
START_SIZE = 4
N_NOISE_FRAMES = N_FRAMES * 4         # 64
NOISE_STEP = N_SAMPLES // N_NOISE_FRAMES   # 64
NOISE_WINDOW = NOISE_STEP * 2         # 128
NOISE_COEFFS = NOISE_WINDOW // 2 + 1  # 65
COEF_PAD = 128                        # 65 zero-padded to a lane-dense 128
MASK_AFTER = 1
LEAKY_SLOPE = 0.2


def leaky(y):
    return jnp.where(y > 0, y, LEAKY_SLOPE * y)


# ------------------------------ fused kernel ---------------------------------
def fused_kernel(x_ref, noise_ref,
                 wcat_ref, bcat_ref,
                 m1_ref, b1_ref, m2_ref, b2_ref,
                 m34_ref, b34_ref, m5_ref, b5_ref, m6_ref, b6_ref,
                 mf_ref, bf_ref, wint_ref, fdft_ref, idft_ref,
                 o_ref):
    """Entire GenerateImpulse forward (nonzero 128-sample window only)."""

    def mm(a, w_ref, b_ref):
        # weights may be stored bf16; upcast in-register, fp32 accumulate.
        return (jnp.dot(a, w_ref[...].astype(jnp.float32),
                        preferred_element_type=jnp.float32) + b_ref[...])

    x = x_ref[...]                                        # (B, latent)

    # Packed same-LHS matmul: [to_env | ConvUpsample-begin Linear].
    pre = mm(x, wcat_ref, bcat_ref)                       # (B, n_frames + ch*4)
    env = jnp.square(pre[:, :N_FRAMES])                   # (B, n_frames)
    h = pre[:, N_FRAMES:]                                 # (B, ch*4)

    # ConvUpsample: 2x [ConvT(4,2,1)+leaky]; the Conv1d(3,1,1) tail is folded
    # into the NoiseModel 1x1 init conv (m34), outputs pruned to frame 0 per
    # channel (exact under MASK_AFTER=1).
    h = leaky(mm(h, m1_ref, b1_ref))                      # (B, ch*8)
    h = leaky(mm(h, m2_ref, b2_ref))                      # (B, ch*16)
    h = leaky(mm(h, m34_ref, b34_ref))                    # (B, ch)  frame-0 only
    h = leaky(mm(h, m5_ref, b5_ref))                      # (B, ch)
    h = leaky(mm(h, m6_ref, b6_ref))                      # (B, ch)
    coeffs = jnp.square(jax.nn.sigmoid(mm(h, mf_ref, bf_ref)))   # (B, 2*COEF_PAD)

    # rFFT -> real filter -> irFFT for the single unmasked noise frame, packed
    # as one forward matmul producing [Re | Im] and one inverse matmul.
    spec = jnp.dot(noise_ref[...], fdft_ref[...].astype(jnp.float32),
                   preferred_element_type=jnp.float32) * coeffs   # (B, 2*COEF_PAD)
    imp = jnp.dot(spec, idft_ref[...].astype(jnp.float32),
                  preferred_element_type=jnp.float32)             # (B, window)

    # Envelope interpolation over the nonzero window + final multiply.
    env_win = jnp.dot(env, wint_ref[...],
                      preferred_element_type=jnp.float32)         # (B, window)

    o_ref[...] = imp * env_win


def generate_impulse_forward(x, noise, folded):
    """x: (B, 1, latent), noise: (B, n_samples) -> (B, 1, n_samples)."""
    B = x.shape[0]
    x2d = x.reshape(B, LATENT_DIM)
    noise_win = noise[:, :NOISE_WINDOW]   # only frame 0 survives MASK_AFTER=1

    args = (x2d, noise_win,
            folded["wcat"], folded["bcat"],
            folded["m1"], folded["b1"], folded["m2"], folded["b2"],
            folded["m34"], folded["b34"], folded["m5"], folded["b5"],
            folded["m6"], folded["b6"], folded["mf"], folded["bf"],
            folded["wint"], folded["fdft"], folded["idft"])

    # Single invocation (no grid): every operand is a full-array VMEM ref, so
    # no double-buffering / index-map machinery is generated (total resident
    # weights ~0.3 MB after pruning + bf16).
    # TODO(synk): for large batches, add a "parallel" batch grid axis so the
    # weights stay VMEM-resident while batch tiles stream (uses v7x's 2nd TC).
    win = pl.pallas_call(
        fused_kernel,
        out_shape=jax.ShapeDtypeStruct((B, NOISE_WINDOW), jnp.float32),
    )(*args)

    # Everything past the first (unmasked) noise frame is exactly zero.
    out = jnp.pad(win, ((0, 0), (0, N_SAMPLES - NOISE_WINDOW)))
    return out.reshape(B, 1, N_SAMPLES)


# ----------------------------- parameter setup --------------------------------
def init_params(key):
    ks = iter(jax.random.split(key, 32))

    def dense(k, shape, fan_in):
        return (jax.random.normal(k, shape, jnp.float32) / np.sqrt(fan_in)).astype(jnp.float32)

    p = {}
    # to_env: Linear(latent_dim, n_frames)
    p["env_w"] = dense(next(ks), (LATENT_DIM, N_FRAMES), LATENT_DIM)
    p["env_b"] = jnp.zeros((N_FRAMES,), jnp.float32)

    # ConvUpsample: Linear(latent, ch*4) -> 2x [ConvT(ch,ch,4,2,1)+leaky] -> Conv1d(ch,ch,3,1,1)
    p["up_begin_w"] = dense(next(ks), (LATENT_DIM, CHANNELS * START_SIZE), LATENT_DIM)
    p["up_begin_b"] = jnp.zeros((CHANNELS * START_SIZE,), jnp.float32)
    n_up = int(np.log2(N_FRAMES) - np.log2(START_SIZE))
    p["up_layers"] = [(dense(next(ks), (CHANNELS, CHANNELS, 4), CHANNELS * 4),
                       jnp.zeros((CHANNELS,), jnp.float32)) for _ in range(n_up)]
    p["up_final_w"] = dense(next(ks), (CHANNELS, CHANNELS, 3), CHANNELS * 3)
    p["up_final_b"] = jnp.zeros((CHANNELS,), jnp.float32)

    # NoiseModel: Conv1d(ch,ch,1) -> 2x [ConvT(ch,ch,4,2,1)+leaky] -> Conv1d(ch,coeffs,1)
    p["nm_init_w"] = dense(next(ks), (CHANNELS, CHANNELS, 1), CHANNELS)
    p["nm_init_b"] = jnp.zeros((CHANNELS,), jnp.float32)
    n_nm = int(np.log2(N_NOISE_FRAMES) - np.log2(N_FRAMES))
    p["nm_layers"] = [(dense(next(ks), (CHANNELS, CHANNELS, 4), CHANNELS * 4),
                       jnp.zeros((CHANNELS,), jnp.float32)) for _ in range(n_nm)]
    p["nm_final_w"] = dense(next(ks), (NOISE_COEFFS, CHANNELS, 1), CHANNELS)
    p["nm_final_b"] = jnp.zeros((NOISE_COEFFS,), jnp.float32)
    return p


# -------------------- host-side weight folding (runs once) -------------------
def _conv1d_matrix(w, length, padding):
    """Fold Conv1d(stride=1) into (Cin*L, Cout*Lout). w: (Cout, Cin, K)."""
    w = np.asarray(w, np.float32)
    c_out, c_in, k = w.shape
    l_out = length + 2 * padding - k + 1
    ll = np.arange(length)[:, None, None]
    kk = np.arange(k)[None, :, None]
    mm = np.arange(l_out)[None, None, :]
    sel = (ll == mm + kk - padding).astype(np.float32)        # (L, K, Lout)
    big = np.einsum('oik,lkm->ilom', w, sel)                  # (Cin, L, Cout, Lout)
    return big.reshape(c_in * length, c_out * l_out)


def _convT_s2_matrix(w, length):
    """Fold ConvTranspose1d(k=4, stride=2, pad=1) into (Cin*L, Cout*2L). w: (Cin, Cout, 4)."""
    w = np.asarray(w, np.float32)
    c_in, c_out, k = w.shape
    l_out = 2 * length
    ll = np.arange(length)[:, None, None]
    kk = np.arange(k)[None, :, None]
    mm = np.arange(l_out)[None, None, :]
    sel = (mm == 2 * ll + kk - 1).astype(np.float32)          # (L, K, Lout)
    big = np.einsum('iok,lkm->ilom', w, sel)
    return big.reshape(c_in * length, c_out * l_out)


def _rep_bias(b, l_out):
    return np.repeat(np.asarray(b, np.float32), l_out).reshape(1, -1)


def build_dft_matrices():
    """Hann-windowed real-DFT / inverse real-DFT matrices (numpy, unpadded)."""
    W, C = NOISE_WINDOW, NOISE_COEFFS
    n = np.arange(W)[:, None]
    k = np.arange(C)[None, :]
    theta = 2.0 * np.pi * n * k / W
    hann = (0.5 - 0.5 * np.cos(2.0 * np.pi * np.arange(W) / W))[:, None]
    cmat = (hann * np.cos(theta)).astype(np.float32)          # (W, C) rfft real part
    smat = (hann * -np.sin(theta)).astype(np.float32)         # (W, C) rfft imag part
    wk = np.where((np.arange(C) == 0) | (np.arange(C) == W // 2), 1.0, 2.0)[:, None]
    cinv = (wk * np.cos(theta.T) / W).astype(np.float32)      # (C, W)
    sinv = (wk * -np.sin(theta.T) / W).astype(np.float32)     # (C, W)
    return cmat, smat, cinv, sinv


def build_interp_matrix(n_in, n_out):
    """Matrix form of F.interpolate(mode='linear', align_corners=False)."""
    i = np.arange(n_out)
    pos = (i + 0.5) * (n_in / n_out) - 0.5
    pos = np.clip(pos, 0.0, n_in - 1)
    i0 = np.floor(pos).astype(np.int64)
    i1 = np.minimum(i0 + 1, n_in - 1)
    frac = (pos - i0).astype(np.float32)
    W = np.zeros((n_in, n_out), np.float32)
    W[i0, i] += (1.0 - frac)
    W[i1, i] += frac
    return W


def fold_params(params):
    """Fold conv kernels into dense matrices, prune the MASK_AFTER=1 dead
    structure out of the noise branch, pack same-LHS matmuls, pad the 65-wide
    spectral axis to 128 lanes and pack [cos|sin] / [icos;isin] DFT matrices
    (stored bf16).  Host-side, runs once."""
    assert len(params["up_layers"]) == 2 and len(params["nm_layers"]) == 2
    f = {}

    # Same-LHS packing of to_env and the ConvUpsample begin Linear.
    f["wcat"] = jnp.asarray(np.concatenate(
        [np.asarray(params["env_w"], np.float32),
         np.asarray(params["up_begin_w"], np.float32)], axis=1))
    f["bcat"] = jnp.asarray(np.concatenate(
        [np.asarray(params["env_b"], np.float32),
         np.asarray(params["up_begin_b"], np.float32)]).reshape(1, -1))

    (w, b) = params["up_layers"][0]
    f["m1"] = jnp.asarray(_convT_s2_matrix(w, START_SIZE))
    f["b1"] = jnp.asarray(_rep_bias(b, 2 * START_SIZE))
    (w, b) = params["up_layers"][1]
    f["m2"] = jnp.asarray(_convT_s2_matrix(w, 2 * START_SIZE))
    f["b2"] = jnp.asarray(_rep_bias(b, 4 * START_SIZE))

    # Indices of (channel c, frame 0) in the channel-major folded layout at the
    # three frame resolutions along the noise branch.
    frame0_16 = np.arange(CHANNELS) * N_FRAMES
    frame0_32 = np.arange(CHANNELS) * (2 * N_FRAMES)
    frame0_64 = np.arange(CHANNELS) * N_NOISE_FRAMES

    # Conv1d(3,1,1) tail of ConvUpsample folded into the NoiseModel 1x1 init
    # conv (no nonlinearity between them), output columns pruned to frame 0.
    # MASK_AFTER=1 kills every other noise frame, and ConvT(4,2,1) frame-0
    # outputs depend only on frame-0 inputs, so this pruning is exact.
    m3 = _conv1d_matrix(params["up_final_w"], N_FRAMES, 1)
    b3 = _rep_bias(params["up_final_b"], N_FRAMES)
    m4 = _conv1d_matrix(params["nm_init_w"], N_FRAMES, 0)
    b4 = _rep_bias(params["nm_init_b"], N_FRAMES)
    f["m34"] = jnp.asarray((m3 @ m4)[:, frame0_16])                # (ch*16, ch)
    f["b34"] = jnp.asarray((b3 @ m4 + b4)[:, frame0_16])           # (1, ch)

    (w, b) = params["nm_layers"][0]
    m5 = _convT_s2_matrix(w, N_FRAMES)
    f["m5"] = jnp.asarray(m5[np.ix_(frame0_16, frame0_32)])        # (ch, ch)
    f["b5"] = jnp.asarray(_rep_bias(b, 2 * N_FRAMES)[:, frame0_32])
    (w, b) = params["nm_layers"][1]
    m6 = _convT_s2_matrix(w, 2 * N_FRAMES)
    f["m6"] = jnp.asarray(m6[np.ix_(frame0_32, frame0_64)])        # (ch, ch)
    f["b6"] = jnp.asarray(_rep_bias(b, 4 * N_FRAMES)[:, frame0_64])

    # nm_final 1x1 conv, frame 0 only; same real filter applied to Re and Im.
    base = np.asarray(params["nm_final_w"], np.float32)[:, :, 0].T  # (ch, coeffs)
    mfin = np.zeros((CHANNELS, COEF_PAD), np.float32)
    mfin[:, :NOISE_COEFFS] = base
    bfin = np.zeros((1, COEF_PAD), np.float32)
    bfin[0, :NOISE_COEFFS] = np.asarray(params["nm_final_b"], np.float32)
    f["mf"] = jnp.asarray(np.concatenate([mfin, mfin], axis=1))     # (ch, 2*COEF_PAD)
    f["bf"] = jnp.asarray(np.concatenate([bfin, bfin], axis=1))

    cmat, smat, cinv, sinv = build_dft_matrices()
    pc = COEF_PAD - NOISE_COEFFS
    cmat = np.pad(cmat, ((0, 0), (0, pc)))
    smat = np.pad(smat, ((0, 0), (0, pc)))
    cinv = np.pad(cinv, ((0, pc), (0, 0)))
    sinv = np.pad(sinv, ((0, pc), (0, 0)))
    # Only remaining >= 64 KB weights: store bf16 (upcast + fp32 acc in-kernel).
    f["fdft"] = jnp.asarray(np.concatenate([cmat, smat], axis=1)).astype(jnp.bfloat16)
    f["idft"] = jnp.asarray(np.concatenate([cinv, sinv], axis=0)).astype(jnp.bfloat16)

    f["wint"] = jnp.asarray(build_interp_matrix(N_FRAMES, N_SAMPLES)[:, :NOISE_WINDOW])
    return f


# --------------------- pure-JAX reference (correctness) ----------------------
def _ref_conv1d(x, w, b, padding):
    B, c_in, L = x.shape
    c_out, _, K = w.shape
    xp = jnp.pad(x, ((0, 0), (0, 0), (padding, padding)))
    l_out = L + 2 * padding - K + 1
    idx = jnp.arange(l_out)[:, None] + jnp.arange(K)[None, :]
    patches = xp[:, :, idx]                                   # (B, Cin, Lout, K)
    return jnp.einsum('bclk,ock->bol', patches, w) + b[None, :, None]


def _ref_convT_s2(x, w, b):
    B, c_in, L = x.shape
    xd = jnp.zeros((B, c_in, 2 * L - 1), x.dtype).at[:, :, ::2].set(x)
    w_eq = jnp.transpose(w[:, :, ::-1], (1, 0, 2))            # (Cout, Cin, 4)
    return _ref_conv1d(xd, w_eq, b, padding=2)


def reference_forward(x, noise, params):
    """Per-op reference with the full 64-frame mask + FFT + overlap-add path."""
    B = x.shape[0]
    x2d = x.reshape(B, LATENT_DIM)
    env = jnp.square(x2d @ params["env_w"] + params["env_b"])
    h = (x2d @ params["up_begin_w"] + params["up_begin_b"]).reshape(B, CHANNELS, START_SIZE)
    for w, b in params["up_layers"]:
        h = leaky(_ref_convT_s2(h, w, b))
    h = _ref_conv1d(h, params["up_final_w"], params["up_final_b"], 1)
    h = leaky(_ref_conv1d(h, params["nm_init_w"], params["nm_init_b"], 0))
    for w, b in params["nm_layers"]:
        h = leaky(_ref_convT_s2(h, w, b))
    coeff = jnp.square(jax.nn.sigmoid(
        _ref_conv1d(h, params["nm_final_w"], params["nm_final_b"], 0)))   # (B, coeffs, F)
    mask = (jnp.arange(N_NOISE_FRAMES) < MASK_AFTER).astype(jnp.float32)
    coeff = coeff * mask[None, None, :]

    noise_p = jnp.pad(noise, ((0, 0), (0, NOISE_WINDOW - NOISE_STEP)))
    idx = jnp.arange(N_NOISE_FRAMES)[:, None] * NOISE_STEP + jnp.arange(NOISE_WINDOW)[None, :]
    frames = noise_p[:, idx]                                              # (B, F, W)
    hann = 0.5 - 0.5 * jnp.cos(2.0 * jnp.pi * jnp.arange(NOISE_WINDOW) / NOISE_WINDOW)
    spec = jnp.fft.rfft(frames * hann[None, None, :], axis=-1)
    filt = jnp.fft.irfft(spec * jnp.transpose(coeff, (0, 2, 1)), n=NOISE_WINDOW, axis=-1)
    first = filt[:, :, :NOISE_STEP].reshape(B, N_SAMPLES)
    second = filt[:, :, NOISE_STEP:].reshape(B, N_SAMPLES)
    audio = first.at[:, NOISE_STEP:].add(second[:, :-NOISE_STEP])
    env_i = env @ jnp.asarray(build_interp_matrix(N_FRAMES, N_SAMPLES))
    return (audio * env_i).reshape(B, 1, N_SAMPLES)


# --------------------------------- main ---------------------------------------
if __name__ == "__main__":
    key = jax.random.PRNGKey(0)
    k_param, k_x, k_noise = jax.random.split(key, 3)

    params = init_params(k_param)
    folded = fold_params(params)

    x = jax.random.normal(k_x, (BATCH, 1, LATENT_DIM), jnp.float32)
    noise = jax.random.uniform(k_noise, (BATCH, N_SAMPLES), jnp.float32, -1.0, 1.0)

    fwd = jax.jit(generate_impulse_forward)
    out = jax.block_until_ready(fwd(x, noise, folded))

    assert out.shape == (BATCH, 1, N_SAMPLES) and out.dtype == jnp.float32
    assert bool(jnp.all(jnp.isfinite(out)))

    # Cross-check the fused + pruned kernel against the per-op pure-JAX reference.
    ref = jax.block_until_ready(reference_forward(x, noise, params))
    err = float(jnp.max(jnp.abs(out - ref)))
    scale = float(jnp.max(jnp.abs(ref)))
    assert err <= 5e-2 * (1.0 + scale), f"mismatch: max|err|={err}, max|ref|={scale}"

    print("KERNEL_OK")
</pallas_src>

<mosaic_0001>
module attributes {stable_mosaic.version = 11 : i64} {
  func.func @fused_kernel(%arg0: memref<2x16xf32, #tpu.memory_space<vmem>>, %arg1: memref<2x128xf32, #tpu.memory_space<vmem>>, %arg2: memref<16x48xf32, #tpu.memory_space<vmem>>, %arg3: memref<1x48xf32, #tpu.memory_space<vmem>>, %arg4: memref<32x64xf32, #tpu.memory_space<vmem>>, %arg5: memref<1x64xf32, #tpu.memory_space<vmem>>, %arg6: memref<64x128xf32, #tpu.memory_space<vmem>>, %arg7: memref<1x128xf32, #tpu.memory_space<vmem>>, %arg8: memref<128x8xf32, #tpu.memory_space<vmem>>, %arg9: memref<1x8xf32, #tpu.memory_space<vmem>>, %arg10: memref<8x8xf32, #tpu.memory_space<vmem>>, %arg11: memref<1x8xf32, #tpu.memory_space<vmem>>, %arg12: memref<8x8xf32, #tpu.memory_space<vmem>>, %arg13: memref<1x8xf32, #tpu.memory_space<vmem>>, %arg14: memref<8x256xf32, #tpu.memory_space<vmem>>, %arg15: memref<1x256xf32, #tpu.memory_space<vmem>>, %arg16: memref<16x128xf32, #tpu.memory_space<vmem>>, %arg17: memref<128x256xbf16, #tpu.memory_space<vmem>>, %arg18: memref<256x128xbf16, #tpu.memory_space<vmem>>, %arg19: memref<2x128xf32, #tpu.memory_space<vmem>>) attributes {dimension_semantics = [], scalar_prefetch = 0 : i64, scratch_operands = 0 : i64, tpu.core_type = #tpu.core_type<tc>} {
    %c0 = arith.constant 0 : index
    %c0_0 = arith.constant 0 : index
    %0 = vector.load %arg0[%c0, %c0_0] : memref<2x16xf32, #tpu.memory_space<vmem>>, vector<2x16xf32>
    %c0_1 = arith.constant 0 : index
    %c0_2 = arith.constant 0 : index
    %1 = vector.load %arg2[%c0_1, %c0_2] : memref<16x48xf32, #tpu.memory_space<vmem>>, vector<16x48xf32>
    %cst = arith.constant dense<0.000000e+00> : vector<2x48xf32>
    %2 = tpu.matmul %0, %1, %cst {dimension_numbers = #tpu.dot_dimension_numbers<[1], [0], [0], [1], [0, 0, 1, 1], [], []>} : vector<2x16xf32>, vector<16x48xf32>, vector<2x48xf32> -> vector<2x48xf32>
    %c0_3 = arith.constant 0 : index
    %c0_4 = arith.constant 0 : index
    %3 = vector.load %arg3[%c0_3, %c0_4] : memref<1x48xf32, #tpu.memory_space<vmem>>, vector<1x48xf32>
    %4 = vector.broadcast %3 : vector<1x48xf32> to vector<2x48xf32>
    %5 = arith.addf %2, %4 : vector<2x48xf32>
    %6 = vector.extract_strided_slice %5 {offsets = [0, 0], sizes = [2, 16], strides = [1, 1]} : vector<2x48xf32> to vector<2x16xf32>
    %7 = arith.mulf %6, %6 : vector<2x16xf32>
    %8 = vector.extract_strided_slice %5 {offsets = [0, 16], sizes = [2, 32], strides = [1, 1]} : vector<2x48xf32> to vector<2x32xf32>
    %c0_5 = arith.constant 0 : index
    %c0_6 = arith.constant 0 : index
    %9 = vector.load %arg4[%c0_5, %c0_6] : memref<32x64xf32, #tpu.memory_space<vmem>>, vector<32x64xf32>
    %cst_7 = arith.constant dense<0.000000e+00> : vector<2x64xf32>
    %10 = tpu.matmul %8, %9, %cst_7 {dimension_numbers = #tpu.dot_dimension_numbers<[1], [0], [0], [1], [0, 0, 1, 1], [], []>} : vector<2x32xf32>, vector<32x64xf32>, vector<2x64xf32> -> vector<2x64xf32>
    %c0_8 = arith.constant 0 : index
    %c0_9 = arith.constant 0 : index
    %11 = vector.load %arg5[%c0_8, %c0_9] : memref<1x64xf32, #tpu.memory_space<vmem>>, vector<1x64xf32>
    %12 = vector.broadcast %11 : vector<1x64xf32> to vector<2x64xf32>
    %13 = arith.addf %10, %12 : vector<2x64xf32>
    %cst_10 = arith.constant 0.000000e+00 : f32
    %14 = vector.broadcast %cst_10 : f32 to vector<2x64xf32>
    %15 = arith.cmpf ogt, %13, %14 : vector<2x64xf32>
    %cst_11 = arith.constant 2.000000e-01 : f32
    %16 = vector.broadcast %cst_11 : f32 to vector<2x64xf32>
    %17 = arith.mulf %16, %13 : vector<2x64xf32>
    %18 = arith.select %15, %13, %17 : vector<2x64xi1>, vector<2x64xf32>
    %c0_12 = arith.constant 0 : index
    %c0_13 = arith.constant 0 : index
    %19 = vector.load %arg6[%c0_12, %c0_13] : memref<64x128xf32, #tpu.memory_space<vmem>>, vector<64x128xf32>
    %cst_14 = arith.constant dense<0.000000e+00> : vector<2x128xf32>
    %20 = tpu.matmul %18, %19, %cst_14 {dimension_numbers = #tpu.dot_dimension_numbers<[1], [0], [0], [1], [0, 0, 1, 1], [], []>} : vector<2x64xf32>, vector<64x128xf32>, vector<2x128xf32> -> vector<2x128xf32>
    %c0_15 = arith.constant 0 : index
    %c0_16 = arith.constant 0 : index
    %21 = vector.load %arg7[%c0_15, %c0_16] : memref<1x128xf32, #tpu.memory_space<vmem>>, vector<1x128xf32>
    %22 = vector.broadcast %21 : vector<1x128xf32> to vector<2x128xf32>
    %23 = arith.addf %20, %22 : vector<2x128xf32>
    %cst_17 = arith.constant 0.000000e+00 : f32
    %24 = vector.broadcast %cst_17 : f32 to vector<2x128xf32>
    %25 = arith.cmpf ogt, %23, %24 : vector<2x128xf32>
    %cst_18 = arith.constant 2.000000e-01 : f32
    %26 = vector.broadcast %cst_18 : f32 to vector<2x128xf32>
    %27 = arith.mulf %26, %23 : vector<2x128xf32>
    %28 = arith.select %25, %23, %27 : vector<2x128xi1>, vector<2x128xf32>
    %c0_19 = arith.constant 0 : index
    %c0_20 = arith.constant 0 : index
    %29 = vector.load %arg8[%c0_19, %c0_20] : memref<128x8xf32, #tpu.memory_space<vmem>>, vector<128x8xf32>
    %cst_21 = arith.constant dense<0.000000e+00> : vector<2x8xf32>
    %30 = tpu.matmul %28, %29, %cst_21 {dimension_numbers = #tpu.dot_dimension_numbers<[1], [0], [0], [1], [0, 0, 1, 1], [], []>} : vector<2x128xf32>, vector<128x8xf32>, vector<2x8xf32> -> vector<2x8xf32>
    %c0_22 = arith.constant 0 : index
    %c0_23 = arith.constant 0 : index
    %31 = vector.load %arg9[%c0_22, %c0_23] : memref<1x8xf32, #tpu.memory_space<vmem>>, vector<1x8xf32>
    %32 = vector.broadcast %31 : vector<1x8xf32> to vector<2x8xf32>
    %33 = arith.addf %30, %32 : vector<2x8xf32>
    %cst_24 = arith.constant 0.000000e+00 : f32
    %34 = vector.broadcast %cst_24 : f32 to vector<2x8xf32>
    %35 = arith.cmpf ogt, %33, %34 : vector<2x8xf32>
    %cst_25 = arith.constant 2.000000e-01 : f32
    %36 = vector.broadcast %cst_25 : f32 to vector<2x8xf32>
    %37 = arith.mulf %36, %33 : vector<2x8xf32>
    %38 = arith.select %35, %33, %37 : vector<2x8xi1>, vector<2x8xf32>
    %c0_26 = arith.constant 0 : index
    %c0_27 = arith.constant 0 : index
    %39 = vector.load %arg10[%c0_26, %c0_27] : memref<8x8xf32, #tpu.memory_space<vmem>>, vector<8x8xf32>
    %cst_28 = arith.constant dense<0.000000e+00> : vector<2x8xf32>
    %40 = tpu.matmul %38, %39, %cst_28 {dimension_numbers = #tpu.dot_dimension_numbers<[1], [0], [0], [1], [0, 0, 1, 1], [], []>} : vector<2x8xf32>, vector<8x8xf32>, vector<2x8xf32> -> vector<2x8xf32>
    %c0_29 = arith.constant 0 : index
    %c0_30 = arith.constant 0 : index
    %41 = vector.load %arg11[%c0_29, %c0_30] : memref<1x8xf32, #tpu.memory_space<vmem>>, vector<1x8xf32>
    %42 = vector.broadcast %41 : vector<1x8xf32> to vector<2x8xf32>
    %43 = arith.addf %40, %42 : vector<2x8xf32>
    %cst_31 = arith.constant 0.000000e+00 : f32
    %44 = vector.broadcast %cst_31 : f32 to vector<2x8xf32>
    %45 = arith.cmpf ogt, %43, %44 : vector<2x8xf32>
    %cst_32 = arith.constant 2.000000e-01 : f32
    %46 = vector.broadcast %cst_32 : f32 to vector<2x8xf32>
    %47 = arith.mulf %46, %43 : vector<2x8xf32>
    %48 = arith.select %45, %43, %47 : vector<2x8xi1>, vector<2x8xf32>
    %c0_33 = arith.constant 0 : index
    %c0_34 = arith.constant 0 : index
    %49 = vector.load %arg12[%c0_33, %c0_34] : memref<8x8xf32, #tpu.memory_space<vmem>>, vector<8x8xf32>
    %cst_35 = arith.constant dense<0.000000e+00> : vector<2x8xf32>
    %50 = tpu.matmul %48, %49, %cst_35 {dimension_numbers = #tpu.dot_dimension_numbers<[1], [0], [0], [1], [0, 0, 1, 1], [], []>} : vector<2x8xf32>, vector<8x8xf32>, vector<2x8xf32> -> vector<2x8xf32>
    %c0_36 = arith.constant 0 : index
    %c0_37 = arith.constant 0 : index
    %51 = vector.load %arg13[%c0_36, %c0_37] : memref<1x8xf32, #tpu.memory_space<vmem>>, vector<1x8xf32>
    %52 = vector.broadcast %51 : vector<1x8xf32> to vector<2x8xf32>
    %53 = arith.addf %50, %52 : vector<2x8xf32>
    %cst_38 = arith.constant 0.000000e+00 : f32
    %54 = vector.broadcast %cst_38 : f32 to vector<2x8xf32>
    %55 = arith.cmpf ogt, %53, %54 : vector<2x8xf32>
    %cst_39 = arith.constant 2.000000e-01 : f32
    %56 = vector.broadcast %cst_39 : f32 to vector<2x8xf32>
    %57 = arith.mulf %56, %53 : vector<2x8xf32>
    %58 = arith.select %55, %53, %57 : vector<2x8xi1>, vector<2x8xf32>
    %c0_40 = arith.constant 0 : index
    %c0_41 = arith.constant 0 : index
    %59 = vector.load %arg14[%c0_40, %c0_41] : memref<8x256xf32, #tpu.memory_space<vmem>>, vector<8x256xf32>
    %cst_42 = arith.constant dense<0.000000e+00> : vector<2x256xf32>
    %60 = tpu.matmul %58, %59, %cst_42 {dimension_numbers = #tpu.dot_dimension_numbers<[1], [0], [0], [1], [0, 0, 1, 1], [], []>} : vector<2x8xf32>, vector<8x256xf32>, vector<2x256xf32> -> vector<2x256xf32>
    %c0_43 = arith.constant 0 : index
    %c0_44 = arith.constant 0 : index
    %61 = vector.load %arg15[%c0_43, %c0_44] : memref<1x256xf32, #tpu.memory_space<vmem>>, vector<1x256xf32>
    %62 = vector.broadcast %61 : vector<1x256xf32> to vector<2x256xf32>
    %63 = arith.addf %60, %62 : vector<2x256xf32>
    %64 = arith.negf %63 : vector<2x256xf32>
    %65 = math.exp %64 : vector<2x256xf32>
    %cst_45 = arith.constant 1.000000e+00 : f32
    %66 = vector.broadcast %cst_45 : f32 to vector<2x256xf32>
    %67 = arith.addf %66, %65 : vector<2x256xf32>
    %68 = arith.divf %66, %67 : vector<2x256xf32>
    %69 = arith.mulf %68, %68 : vector<2x256xf32>
    %c0_46 = arith.constant 0 : index
    %c0_47 = arith.constant 0 : index
    %70 = vector.load %arg1[%c0_46, %c0_47] : memref<2x128xf32, #tpu.memory_space<vmem>>, vector<2x128xf32>
    %c0_48 = arith.constant 0 : index
    %c0_49 = arith.constant 0 : index
    %71 = vector.load %arg17[%c0_48, %c0_49] : memref<128x256xbf16, #tpu.memory_space<vmem>>, vector<128x256xbf16>
    %72 = arith.extf %71 : vector<128x256xbf16> to vector<128x256xf32>
    %cst_50 = arith.constant dense<0.000000e+00> : vector<2x256xf32>
    %73 = tpu.matmul %70, %72, %cst_50 {dimension_numbers = #tpu.dot_dimension_numbers<[1], [0], [0], [1], [0, 0, 1, 1], [], []>} : vector<2x128xf32>, vector<128x256xf32>, vector<2x256xf32> -> vector<2x256xf32>
    %74 = arith.mulf %73, %69 : vector<2x256xf32>
    %c0_51 = arith.constant 0 : index
    %c0_52 = arith.constant 0 : index
    %75 = vector.load %arg18[%c0_51, %c0_52] : memref<256x128xbf16, #tpu.memory_space<vmem>>, vector<256x128xbf16>
    %76 = arith.extf %75 : vector<256x128xbf16> to vector<256x128xf32>
    %cst_53 = arith.constant dense<0.000000e+00> : vector<2x128xf32>
    %77 = tpu.matmul %74, %76, %cst_53 {dimension_numbers = #tpu.dot_dimension_numbers<[1], [0], [0], [1], [0, 0, 1, 1], [], []>} : vector<2x256xf32>, vector<256x128xf32>, vector<2x128xf32> -> vector<2x128xf32>
    %c0_54 = arith.constant 0 : index
    %c0_55 = arith.constant 0 : index
    %78 = vector.load %arg16[%c0_54, %c0_55] : memref<16x128xf32, #tpu.memory_space<vmem>>, vector<16x128xf32>
    %cst_56 = arith.constant dense<0.000000e+00> : vector<2x128xf32>
    %79 = tpu.matmul %7, %78, %cst_56 {dimension_numbers = #tpu.dot_dimension_numbers<[1], [0], [0], [1], [0, 0, 1, 1], [], []>} : vector<2x16xf32>, vector<16x128xf32>, vector<2x128xf32> -> vector<2x128xf32>
    %80 = arith.mulf %77, %79 : vector<2x128xf32>
    %c0_57 = arith.constant 0 : index
    %c0_58 = arith.constant 0 : index
    %81 = vector.load %arg19[%c0_57, %c0_58] : memref<2x128xf32, #tpu.memory_space<vmem>>, vector<2x128xf32>
    tpu.vector_store %arg19[%c0_57, %c0_58], %80 {strides = array<i32>} : memref<2x128xf32, #tpu.memory_space<vmem>>, vector<2x128xf32>,
    return
  }
}

</mosaic_0001>

<bundles_post_ra>
// kernel: generate_impulse_forward.1
= control target key start
LH: loop header
LB: loop body
LE: loop exit
PB: predicated region body
PF: predicated region fallthrough
CT: control target
= control target key end

     0   :  { %s2354_s0 = inlined_call_operand.hbm [shape: f32[2,16], index: 0, kind: input, shape index: {}]   ;;  %s2355_s1 = inlined_call_operand.vmem [shape: f32[2,128], index: 1, kind: input, shape index: {}]   ;;  %s2356_s2 = inlined_call_operand.vmem [shape: f32[16,48], index: 2, kind: input, shape index: {}]   ;;  %s2357_s3 = inlined_call_operand.hbm [shape: f32[1,48], index: 3, kind: input, shape index: {}]   ;;  %s2358_s4 = inlined_call_operand.vmem [shape: f32[32,64], index: 4, kind: input, shape index: {}]   ;;  %s2359_s5 = inlined_call_operand.hbm [shape: f32[1,64], index: 5, kind: input, shape index: {}]   ;;  %s2360_s6 = inlined_call_operand.hbm [shape: f32[64,128], index: 6, kind: input, shape index: {}]   ;;  %s2361_s7 = inlined_call_operand.hbm [shape: f32[1,128], index: 7, kind: input, shape index: {}]   ;;  %s2362_s8 = inlined_call_operand.vmem [shape: f32[128,8], index: 8, kind: input, shape index: {}]   ;;  %s2363_s9 = inlined_call_operand.hbm [shape: f32[1,8], index: 9, kind: input, shape index: {}]   ;;  %s2364_s10 = inlined_call_operand.hbm [shape: f32[8,8], index: 10, kind: input, shape index: {}]   ;;  %s2365_s11 = inlined_call_operand.hbm [shape: f32[1,8], index: 11, kind: input, shape index: {}]   ;;  %s2366_s12 = inlined_call_operand.hbm [shape: f32[8,8], index: 12, kind: input, shape index: {}]   ;;  %s2367_s13 = inlined_call_operand.hbm [shape: f32[1,8], index: 13, kind: input, shape index: {}]   ;;  %s2368_s14 = inlined_call_operand.vmem [shape: f32[8,256], index: 14, kind: input, shape index: {}]   ;;  %s2369_s15 = inlined_call_operand.hbm [shape: f32[1,256], index: 15, kind: input, shape index: {}]   ;;  %s2370_s16 = inlined_call_operand.vmem [shape: f32[16,128], index: 16, kind: input, shape index: {}]   ;;  %s2371_s17 = inlined_call_operand.vmem [shape: bf16[128,256], index: 17, kind: input, shape index: {}]   ;;  %s2372_s18 = inlined_call_operand.hbm [shape: bf16[256,128], index: 18, kind: input, shape index: {}]   ;;  %s2373_s19 = inlined_call_operand.vmem [shape: f32[2,128], index: 19, kind: output, shape index: {}]  }
   0x1   :  { %2377 = sst [smem:[#allocation28_spill]] %s2354_s0 }
   0x2   :  { %2378 = sst [smem:[#allocation29_spill]] %s2355_s1 }
   0x3   :  { %2379 = sst [smem:[#allocation30_spill]] %s2356_s2 }
   0x4   :  { %2380 = sst [smem:[#allocation31_spill]] %s2357_s3 }
   0x5   :  { %2381 = sst [smem:[#allocation32_spill]] %s2373_s19 }
   0x6   :  { %24 = vsyncpa [#allocation3], 0 }
   0x7   :  { %25 = vsyncpa [#allocation5], 0 }
   0x8   :  { %26 = vsyncpa [#allocation8], 0 }
   0x9   :  { %27 = vsyncpa [#allocation11], 0 }
   0xa   :  { %28 = vsyncpa [#allocation14], 0 }
   0xb   :  { %29 = vsyncpa [#allocation17], 0 }
   0xc   :  { %30 = vsyncpa [#allocation20], 0  ;;  %s1900_s0 = smov [#allocation4]   ;;  %s1901_s20 = smov [#allocation7]  }
   0xd   :  { %s51_s30 = sshll.u32 %s1900_s0, 4  ;;  %s72_s21 = sshll.u32 %s1901_s20, 4  ;;  %s52_s30 = int_to_ptr.vmem [resolvable:$true] %s51_s30  ;;  %s2020_s21 = int_to_ptr.vmem [resolvable:$true] %s72_s21 }
   0xe   :  { %s2382_s2 = sld [smem:[#allocation31_spill]] }
  0x14   :  { %s1622_s23 = scalar_lea.hbm %s2382_s2, 16 }
  0x15   :  { %p1623_p0 = scmp.ne.s32.totalorder %s2382_s2, %s1622_s23  ;;  %p1626_p1 = scmp.lt.u32.totalorder %s1622_s23, %s2382_s2 }
  0x17   :  { %p1628_p2 = pnand %p1626_p1, %p1623_p0 }
  0x19   :  { %1631 = shalt.err (!%p1628_p2)
}
  0x1a   :  { %s1632_s27 = scalar_lea.vmem %s52_s30, 16  ;;  %s1636_s28 = scalar_lea.vmem %s52_s30, 32 }
  0x1b   :  { %p1633_p3 = scmp.ne.s32.totalorder %s52_s30, %s1632_s27  ;;  %p1637_p4 = scmp.lt.s32.totalorder %s52_s30, %s52_s30 }
  0x1c   :  { %p1638_p5 = scmp.lt.s32.totalorder %s1636_s28, %s1632_s27 }
  0x1e   :  { %p1639_p6 = por %p1638_p5, %p1637_p4 }
  0x20   :  { %p1640_p7 = pnand %p1639_p6, %p1633_p3 }
  0x22   :  { %1643 = shalt.err (!%p1640_p7)
}
  0x23   :  { %54 = dma.hbm_to_vmem [thread:$0]  %s2382_s2, 16, %s52_s30, [#allocation5]  }
  0x24   :  { %s1644_s22 = scalar_lea.hbm %s2360_s6, 1024 }
  0x25   :  { %p1645_p8 = scmp.ne.s32.totalorder %s2360_s6, %s1644_s22  ;;  %p1648_p9 = scmp.lt.u32.totalorder %s1644_s22, %s2360_s6 }
  0x27   :  { %p1650_p10 = pnand %p1648_p9, %p1645_p8 }
  0x29   :  { %1653 = shalt.err (!%p1650_p10)
}
  0x2a   :  { %s1654_s26 = scalar_lea.vmem %s2020_s21, 1024  ;;  %p1659_p12 = scmp.lt.s32.totalorder %s2020_s21, %s2020_s21 }
  0x2b   :  { %p1655_p11 = scmp.ne.s32.totalorder %s2020_s21, %s1654_s26  ;;  %p1660_p13 = scmp.lt.s32.totalorder %s1654_s26, %s1654_s26 }
  0x2d   :  { %p1661_p0 = por %p1660_p13, %p1659_p12 }
  0x2f   :  { %p1662_p1 = pnand %p1661_p0, %p1655_p11 }
  0x31   :  { %1665 = shalt.err (!%p1662_p1)
}
  0x32   :  { %s1902_s30 = smov 128   ;;  %s1903_s2 = smov 8  }
  0x33   :  { %78 = dma.hbm_to_vmem [thread:$0]  %s2360_s6, 1024, %s2020_s21, [#allocation8], %s1902_s30, %s1902_s30, %s1903_s2  }
  0x34   :  { %s1904_s29 = smov [#allocation10]   ;;  %s1905_s20 = smov [#allocation13]  }
  0x35   :  { %s97_s0 = sshll.u32 %s1904_s29, 4  ;;  %s117_s1 = sshll.u32 %s1905_s20, 4  ;;  %s98_s0 = int_to_ptr.vmem [resolvable:$true] %s97_s0  ;;  %s118_s1 = int_to_ptr.vmem [resolvable:$true] %s117_s1 }
  0x36   :  { %s1666_s23 = scalar_lea.hbm %s2363_s9, 16 }
  0x37   :  { %p1667_p2 = scmp.ne.s32.totalorder %s2363_s9, %s1666_s23  ;;  %p1670_p3 = scmp.lt.u32.totalorder %s1666_s23, %s2363_s9 }
  0x39   :  { %p1672_p4 = pnand %p1670_p3, %p1667_p2 }
  0x3b   :  { %1675 = shalt.err (!%p1672_p4)
}
  0x3c   :  { %s1676_s6 = scalar_lea.vmem %s98_s0, 16  ;;  %s1680_s21 = scalar_lea.vmem %s98_s0, 32 }
  0x3d   :  { %p1677_p5 = scmp.ne.s32.totalorder %s98_s0, %s1676_s6  ;;  %p1681_p6 = scmp.lt.s32.totalorder %s98_s0, %s98_s0 }
  0x3e   :  { %p1682_p7 = scmp.lt.s32.totalorder %s1680_s21, %s1676_s6 }
  0x40   :  { %p1683_p8 = por %p1682_p7, %p1681_p6 }
  0x42   :  { %p1684_p9 = pnand %p1683_p8, %p1677_p5 }
  0x44   :  { %1687 = shalt.err (!%p1684_p9)
}
  0x45   :  { %100 = dma.hbm_to_vmem [thread:$0]  %s2363_s9, 16, %s98_s0, [#allocation11]  }
  0x46   :  { %s1688_s29 = scalar_lea.hbm %s2365_s11, 16 }
  0x47   :  { %p1689_p10 = scmp.ne.s32.totalorder %s2365_s11, %s1688_s29  ;;  %p1692_p11 = scmp.lt.u32.totalorder %s1688_s29, %s2365_s11 }
  0x49   :  { %p1694_p12 = pnand %p1692_p11, %p1689_p10 }
  0x4b   :  { %1697 = shalt.err (!%p1694_p12)
}
  0x4c   :  { %s1698_s23 = scalar_lea.vmem %s118_s1, 16  ;;  %s1702_s25 = scalar_lea.vmem %s118_s1, 32 }
  0x4d   :  { %p1699_p13 = scmp.ne.s32.totalorder %s118_s1, %s1698_s23  ;;  %p1703_p0 = scmp.lt.s32.totalorder %s118_s1, %s118_s1 }
  0x4e   :  { %p1704_p1 = scmp.lt.s32.totalorder %s1702_s25, %s1698_s23 }
  0x50   :  { %p1705_p2 = por %p1704_p1, %p1703_p0 }
  0x52   :  { %p1706_p3 = pnand %p1705_p2, %p1699_p13 }
  0x54   :  { %1709 = shalt.err (!%p1706_p3)
}
  0x55   :  { %120 = dma.hbm_to_vmem [thread:$0]  %s2365_s11, 16, %s118_s1, [#allocation14]  }
  0x56   :  { %s1906_s3 = smov [#allocation16]   ;;  %s1907_s6 = smov [#allocation2]  }
  0x57   :  { %s137_s26 = sshll.u32 %s1906_s3, 4  ;;  %s37_s21 = sshll.u32 %s1907_s6, 4  ;;  %s138_s26 = int_to_ptr.vmem [resolvable:$true] %s137_s26  ;;  %s38_s21 = int_to_ptr.vmem [resolvable:$true] %s37_s21 }
  0x58   :  { %s1710_s27 = scalar_lea.hbm %s2367_s13, 16 }
  0x59   :  { %p1711_p4 = scmp.ne.s32.totalorder %s2367_s13, %s1710_s27  ;;  %p1714_p5 = scmp.lt.u32.totalorder %s1710_s27, %s2367_s13 }
  0x5b   :  { %p1716_p6 = pnand %p1714_p5, %p1711_p4 }
  0x5d   :  { %1719 = shalt.err (!%p1716_p6)
}
  0x5e   :  { %s1720_s11 = scalar_lea.vmem %s138_s26, 16  ;;  %s1724_s1 = scalar_lea.vmem %s138_s26, 32 }
  0x5f   :  { %p1721_p7 = scmp.ne.s32.totalorder %s138_s26, %s1720_s11  ;;  %p1725_p8 = scmp.lt.s32.totalorder %s138_s26, %s138_s26 }
  0x60   :  { %p1726_p9 = scmp.lt.s32.totalorder %s1724_s1, %s1720_s11 }
  0x62   :  { %p1727_p10 = por %p1726_p9, %p1725_p8 }
  0x64   :  { %p1728_p11 = pnand %p1727_p10, %p1721_p7 }
  0x66   :  { %1731 = shalt.err (!%p1728_p11)
}
  0x67   :  { %140 = dma.hbm_to_vmem [thread:$0]  %s2367_s13, 16, %s138_s26, [#allocation17]  }
  0x68   :  { %s2383_s9 = sld [smem:[#allocation28_spill]] }
  0x6e   :  { %s1732_s0 = scalar_lea.hbm %s2383_s9, 32 }
  0x6f   :  { %p1733_p12 = scmp.ne.s32.totalorder %s2383_s9, %s1732_s0  ;;  %p1736_p13 = scmp.lt.u32.totalorder %s1732_s0, %s2383_s9 }
  0x71   :  { %p1738_p0 = pnand %p1736_p13, %p1733_p12 }
  0x73   :  { %1741 = shalt.err (!%p1738_p0)
}
  0x74   :  { %s1742_s27 = scalar_lea.vmem %s38_s21, 32  ;;  %p1747_p2 = scmp.lt.s32.totalorder %s38_s21, %s38_s21 }
  0x75   :  { %p1743_p1 = scmp.ne.s32.totalorder %s38_s21, %s1742_s27  ;;  %p1748_p3 = scmp.lt.s32.totalorder %s1742_s27, %s1742_s27 }
  0x77   :  { %p1749_p4 = por %p1748_p3, %p1747_p2 }
  0x79   :  { %p1750_p5 = pnand %p1749_p4, %p1743_p1 }
  0x7b   :  { %1753 = shalt.err (!%p1750_p5)
}
  0x7c   :  { %40 = dma.hbm_to_vmem [thread:$0]  %s2383_s9, 32, %s38_s21, [#allocation3]  }
  0x7d   :  { %s1908_s28 = smov [#allocation6]   ;;  %s1909_s19 = smov [#allocation9]  }
  0x7e   :  { %s63_s29 = sshll.u32 %s1908_s28, 4  ;;  %s85_s20 = sshll.u32 %s1909_s19, 4  ;;  %s64_s29 = int_to_ptr.vmem [resolvable:$true] %s63_s29  ;;  %s86_s20 = int_to_ptr.vmem [resolvable:$true] %s85_s20 }
  0x7f   :  { %s1754_s22 = scalar_lea.hbm %s2359_s5, 16 }
  0x80   :  { %p1755_p6 = scmp.ne.s32.totalorder %s2359_s5, %s1754_s22  ;;  %p1758_p7 = scmp.lt.u32.totalorder %s1754_s22, %s2359_s5 }
  0x82   :  { %p1760_p8 = pnand %p1758_p7, %p1755_p6 }
  0x84   :  { %1763 = shalt.err (!%p1760_p8)
}
  0x85   :  { %s1764_s21 = scalar_lea.vmem %s64_s29, 16  ;;  %s1768_s9 = scalar_lea.vmem %s64_s29, 32 }
  0x86   :  { %p1765_p9 = scmp.ne.s32.totalorder %s64_s29, %s1764_s21  ;;  %p1769_p10 = scmp.lt.s32.totalorder %s64_s29, %s64_s29 }
  0x87   :  { %p1770_p11 = scmp.lt.s32.totalorder %s1768_s9, %s1764_s21 }
  0x89   :  { %p1771_p12 = por %p1770_p11, %p1769_p10 }
  0x8b   :  { %p1772_p13 = pnand %p1771_p12, %p1765_p9 }
  0x8d   :  { %1775 = shalt.err (!%p1772_p13)
}
  0x8e   :  { %66 = dma.hbm_to_vmem [thread:$0]  %s2359_s5, 16, %s64_s29, [#allocation5]  }
  0x8f   :  { %s1776_s27 = scalar_lea.hbm %s2361_s7, 16 }
  0x90   :  { %p1777_p0 = scmp.ne.s32.totalorder %s2361_s7, %s1776_s27  ;;  %p1780_p1 = scmp.lt.u32.totalorder %s1776_s27, %s2361_s7 }
  0x92   :  { %p1782_p2 = pnand %p1780_p1, %p1777_p0 }
  0x94   :  { %1785 = shalt.err (!%p1782_p2)
}
  0x95   :  { %s1786_s11 = scalar_lea.vmem %s86_s20, 16  ;;  %s1790_s1 = scalar_lea.vmem %s86_s20, 32 }
  0x96   :  { %p1787_p3 = scmp.ne.s32.totalorder %s86_s20, %s1786_s11  ;;  %p1791_p4 = scmp.lt.s32.totalorder %s86_s20, %s86_s20 }
  0x97   :  { %p1792_p5 = scmp.lt.s32.totalorder %s1790_s1, %s1786_s11 }
  0x99   :  { %p1793_p6 = por %p1792_p5, %p1791_p4 }
  0x9b   :  { %p1794_p7 = pnand %p1793_p6, %p1787_p3 }
  0x9d   :  { %1797 = shalt.err (!%p1794_p7)
}
  0x9e   :  { %88 = dma.hbm_to_vmem [thread:$0]  %s2361_s7, 16, %s86_s20, [#allocation8]  }
  0x9f   :  { %s1910_s22 = smov [#allocation12]   ;;  %s1911_s23 = smov [#allocation15]  }
  0xa0   :  { %s107_s24 = sshll.u32 %s1910_s22, 4  ;;  %s127_s25 = sshll.u32 %s1911_s23, 4  ;;  %s108_s24 = int_to_ptr.vmem [resolvable:$true] %s107_s24  ;;  %s128_s25 = int_to_ptr.vmem [resolvable:$true] %s127_s25 }
  0xa1   :  { %s1798_s9 = scalar_lea.hbm %s2364_s10, 128 }
  0xa2   :  { %p1799_p8 = scmp.ne.s32.totalorder %s2364_s10, %s1798_s9  ;;  %p1802_p9 = scmp.lt.u32.totalorder %s1798_s9, %s2364_s10 }
  0xa4   :  { %p1804_p10 = pnand %p1802_p9, %p1799_p8 }
  0xa6   :  { %1807 = shalt.err (!%p1804_p10)
}
  0xa7   :  { %s1808_s7 = scalar_lea.vmem %s108_s24, 128  ;;  %p1813_p12 = scmp.lt.s32.totalorder %s108_s24, %s108_s24 }
  0xa8   :  { %p1809_p11 = scmp.ne.s32.totalorder %s108_s24, %s1808_s7  ;;  %p1814_p13 = scmp.lt.s32.totalorder %s1808_s7, %s1808_s7 }
  0xaa   :  { %p1815_p0 = por %p1814_p13, %p1813_p12 }
  0xac   :  { %p1816_p1 = pnand %p1815_p0, %p1809_p11 }
  0xae   :  { %1819 = shalt.err (!%p1816_p1)
}
  0xaf   :  { %110 = dma.hbm_to_vmem [thread:$0]  %s2364_s10, 128, %s108_s24, [#allocation11]  }
  0xb0   :  { %s1820_s28 = scalar_lea.hbm %s2366_s12, 128 }
  0xb1   :  { %p1821_p2 = scmp.ne.s32.totalorder %s2366_s12, %s1820_s28  ;;  %p1824_p3 = scmp.lt.u32.totalorder %s1820_s28, %s2366_s12 }
  0xb3   :  { %p1826_p4 = pnand %p1824_p3, %p1821_p2 }
  0xb5   :  { %1829 = shalt.err (!%p1826_p4)
}
  0xb6   :  { %s1830_s29 = scalar_lea.vmem %s128_s25, 128  ;;  %p1835_p6 = scmp.lt.s32.totalorder %s128_s25, %s128_s25 }
  0xb7   :  { %p1831_p5 = scmp.ne.s32.totalorder %s128_s25, %s1830_s29  ;;  %p1836_p7 = scmp.lt.s32.totalorder %s1830_s29, %s1830_s29 }
  0xb9   :  { %p1837_p8 = por %p1836_p7, %p1835_p6 }
  0xbb   :  { %p1838_p9 = pnand %p1837_p8, %p1831_p5 }
  0xbd   :  { %1841 = shalt.err (!%p1838_p9)
}
  0xbe   :  { %130 = dma.hbm_to_vmem [thread:$0]  %s2366_s12, 128, %s128_s25, [#allocation14]  }
  0xbf   :  { %s1912_s24 = smov [#allocation18]   ;;  %s1913_s0 = smov [#allocation19]  }
  0xc0   :  { %s149_s23 = sshll.u32 %s1912_s24, 4  ;;  %s162_s21 = sshll.u32 %s1913_s0, 4  ;;  %s150_s23 = int_to_ptr.vmem [resolvable:$true] %s149_s23  ;;  %s2147_s21 = int_to_ptr.vmem [resolvable:$true] %s162_s21 }
  0xc1   :  { %s1842_s6 = scalar_lea.hbm %s2369_s15, 32 }
  0xc2   :  { %p1843_p10 = scmp.ne.s32.totalorder %s2369_s15, %s1842_s6  ;;  %p1846_p11 = scmp.lt.u32.totalorder %s1842_s6, %s2369_s15 }
  0xc4   :  { %p1848_p12 = pnand %p1846_p11, %p1843_p10 }
  0xc6   :  { %1851 = shalt.err (!%p1848_p12)
}
  0xc7   :  { %s1852_s12 = scalar_lea.vmem %s150_s23, 32  ;;  %p1857_p0 = scmp.lt.s32.totalorder %s150_s23, %s150_s23 }
  0xc8   :  { %p1853_p13 = scmp.ne.s32.totalorder %s150_s23, %s1852_s12  ;;  %p1858_p1 = scmp.lt.s32.totalorder %s1852_s12, %s1852_s12 }
  0xca   :  { %p1859_p2 = por %p1858_p1, %p1857_p0 }
  0xcc   :  { %p1860_p3 = pnand %p1859_p2, %p1853_p13 }
  0xce   :  { %1863 = shalt.err (!%p1860_p3)
}
  0xcf   :  { %152 = dma.hbm_to_vmem [thread:$0]  %s2369_s15, 32, %s150_s23, [#allocation17]  }
  0xd0   :  { %s1864_s28 = scalar_lea.hbm %s2372_s18, 2048 }
  0xd1   :  { %p1865_p4 = scmp.ne.s32.totalorder %s2372_s18, %s1864_s28  ;;  %p1868_p5 = scmp.lt.u32.totalorder %s1864_s28, %s2372_s18 }
  0xd3   :  { %p1870_p6 = pnand %p1868_p5, %p1865_p4 }
  0xd5   :  { %1873 = shalt.err (!%p1870_p6)
}
  0xd6   :  { %s1874_s29 = scalar_lea.vmem %s2147_s21, 2048  ;;  %p1879_p8 = scmp.lt.s32.totalorder %s2147_s21, %s2147_s21 }
  0xd7   :  { %p1875_p7 = scmp.ne.s32.totalorder %s2147_s21, %s1874_s29  ;;  %p1880_p9 = scmp.lt.s32.totalorder %s1874_s29, %s1874_s29 }
  0xd9   :  { %p1881_p10 = por %p1880_p9, %p1879_p8 }
  0xdb   :  { %p1882_p11 = pnand %p1881_p10, %p1875_p7 }
  0xdd   :  { %1885 = shalt.err (!%p1882_p11)
}
  0xde   :  { %s1914_s15 = smov 64   ;;  %s1915_s10 = smov 4  }
  0xdf   :  { %168 = dma.hbm_to_vmem [thread:$0]  %s2372_s18, 2048, %s2147_s21, [#allocation20], %s1914_s15, %s1914_s15, %s1915_s10  }
  0xe0   :  { %1886 = dma.done.wait [#allocation3], 32  }
  0xe1   :  { %1887 = vsyncadd [#allocation3], 4294967264 }
  0xe2   :  { %1888 = dma.done.wait [#allocation5], 32  }
  0xe3   :  { %1889 = vsyncadd [#allocation5], 4294967264 }
  0xe4   :  { %1890 = dma.done.wait [#allocation8], 1040  }
  0xe5   :  { %1891 = vsyncadd [#allocation8], 4294966256 }
  0xe6   :  { %1892 = dma.done.wait [#allocation11], 144  }
  0xe7   :  { %1893 = vsyncadd [#allocation11], 4294967152 }
  0xe8   :  { %1894 = dma.done.wait [#allocation14], 144  }
  0xe9   :  { %1895 = vsyncadd [#allocation14], 4294967152 }
  0xea   :  { %1896 = dma.done.wait [#allocation17], 48  }
  0xeb   :  { %1897 = vsyncadd [#allocation17], 4294967248 }
  0xec   :  { %1898 = dma.done.wait [#allocation20], 2048  }
  0xed   :  { %1899 = vsyncadd [#allocation20], 4294965248  ;;  %v1916_v0 = vmov 0.0|0.0   ;;  %vm1917_vm0 = vmmov 0   ;;  %v1918_v1 = vmov 0.0   ;;  %s2384_s0 = sld [smem:[#allocation30_spill]] }
  0xee   :  { %1442 = vmatprep.subr.bf16.mxu0 %v1916_v0  ;;  %1357 = vmatprep.mubr.msk.f32.mxu0 %vm1917_vm0, %v1918_v1  ;;  %v205_v5 = vld [vmem:[#allocation2] sm:$0x3]  ;;  %vm215_vm1 = vcmask 130048   ;;  %v291_v7 = vld [vmem:[%s2358_s4 + $0x8] sm:$0xff]  ;;  %v292_v8 = vld [vmem:[%s2358_s4 + $0x10] sm:$0xff]  ;;  %vm304_vm2 = vcmask 261120  }
  0xef   :  { %1445 = vmatprep.subr.bf16.mxu1 %v1916_v0  ;;  %1368 = vmatprep.mubr.msk.f32.mxu1 %vm1917_vm0, %v1918_v1  ;;  %v290_v6 = vld [vmem:[%s2358_s4] sm:$0xff]  ;;  %v293_v10 = vld [vmem:[%s2358_s4 + $0x18] sm:$0xff]  ;;  %v381_v13 = vld [vmem:[#allocation7 + $0x8] sm:$0xff]  ;;  %s1919_s4 = smov 112   ;;  %vm395_vm4 = vcmask 523264   ;;  %vm576_vm7 = vcmask 64512  }
  0xf0   :  { %v1446_v9 = vpack.c.bf16 %v291_v7, %v290_v6  ;;  %v1449_v11 = vpack.c.bf16 %v293_v10, %v292_v8  ;;  %v380_v12 = vld [vmem:[#allocation7] sm:$0xff]  ;;  %v382_v14 = vld [vmem:[#allocation7 + $0x10] sm:$0xff]  ;;  %v383_v16 = vld [vmem:[#allocation7 + $0x18] sm:$0xff]  ;;  %s2385_s21 = sld [smem:[#allocation29_spill]]  ;;  %s2386_s9 = sld [smem:[#allocation32_spill]] }
  0xf1   :  { %v1452_v15 = vpack.c.bf16 %v381_v13, %v380_v12  ;;  %v1455_v17 = vpack.c.bf16 %v383_v16, %v382_v14  ;;  %v384_v18 = vld [vmem:[#allocation7 + $0x20] sm:$0xff]  ;;  %v385_v19 = vld [vmem:[#allocation7 + $0x28] sm:$0xff]  ;;  %v1183_v21 = vld [vmem:[#allocation4] ss:$0 sm:$0xff] }
  0xf2   :  { %1447 = vmatpush3.bf16.msra.mxu1 %v1446_v9  ;;  %v1458_v20 = vpack.c.bf16 %v385_v19, %v384_v18  ;;  %v386_v26 = vld [vmem:[#allocation7 + $0x30] sm:$0xff]  ;;  %v387_v27 = vld [vmem:[#allocation7 + $0x38] sm:$0xff]  ;;  %v473_v30 = vld [vmem:[%s2362_s8 + $0x8] sm:$0xff] }
  0xf3   :  { %v206_v2 = vld [vmem:[%s2384_s0] sm:$0xff]  ;;  %v207_v3 = vld [vmem:[%s2384_s0 + $0x8] sm:$0xff]  ;;  %1448 = vmatprep.subr.bf16.mxu1 %v1916_v0  ;;  %v1461_v28 = vpack.c.bf16 %v387_v27, %v386_v26  ;;  %v474_v31 = vld [vmem:[%s2362_s8 + $0x10] sm:$0xff] }
  0xf4   :  { %v1443_v4 = vpack.c.bf16 %v207_v3, %v206_v2  ;;  %v472_v29 = vld [vmem:[%s2362_s8] sm:$0xff]  ;;  %v475_v33 = vld [vmem:[%s2362_s8 + $0x18] sm:$0xff]  ;;  %v477_v36 = vld [vmem:[%s2362_s8 + $0x28] sm:$0xff] }
  0xf5   :  { %v1464_v32 = vpack.c.bf16 %v473_v30, %v472_v29  ;;  %v1467_v34 = vpack.c.bf16 %v475_v33, %v474_v31  ;;  %v476_v35 = vld [vmem:[%s2362_s8 + $0x20] sm:$0xff]  ;;  %v478_v38 = vld [vmem:[%s2362_s8 + $0x30] sm:$0xff]  ;;  %v479_v39 = vld [vmem:[%s2362_s8 + $0x38] sm:$0xff] }
  0xf6   :  { %1444 = vmatpush3.bf16.msra.mxu0 %v1443_v4  ;;  %1450 = vmatpush3.bf16.msra.mxu1 %v1449_v11  ;;  %v1470_v37 = vpack.c.bf16 %v477_v36, %v476_v35  ;;  %v1473_v40 = vpack.c.bf16 %v479_v39, %v478_v38  ;;  %v480_v41 = vld [vmem:[%s2362_s8 + $0x40] sm:$0xff]  ;;  %v481_v42 = vld [vmem:[%s2362_s8 + $0x48] sm:$0xff]  ;;  %v482_v44 = vld [vmem:[%s2362_s8 + $0x50] sm:$0xff] }
  0xf7   :  { %1451 = vmatprep.subr.bf16.mxu0 %v1916_v0  ;;  %1463 = vmatprep.subr.bf16.mxu1 %v1916_v0  ;;  %v1476_v43 = vpack.c.bf16 %v481_v42, %v480_v41  ;;  %v483_v45 = vld [vmem:[%s2362_s8 + $0x58] sm:$0xff]  ;;  %v484_v47 = vld [vmem:[%s2362_s8 + $0x60] sm:$0xff]  ;;  %v485_v48 = vld [vmem:[%s2362_s8 + $0x68] sm:$0xff] }
  0xf8   :  { %v1479_v46 = vpack.c.bf16 %v483_v45, %v482_v44  ;;  %v1482_v49 = vpack.c.bf16 %v485_v48, %v484_v47  ;;  %v1185_v50 = vld [vmem:[#allocation6] ss:$0 sm:$0xff]  ;;  %v486_v56 = vld [vmem:[%s2362_s8 + $0x70] sm:$0xff]  ;;  %v487_v57 = vld [vmem:[%s2362_s8 + $0x78] sm:$0xff] }
  0xf9   :  { %1358 = vmatmul.mubr.msk.f32.vlgmr.msra.gmra.mrb[0].mxu0 %vm215_vm1, %v205_v5  ;;  %v1485_v58 = vpack.c.bf16 %v487_v57, %v486_v56  ;;  %v1187_v59 = vld [vmem:[#allocation9] ss:$0 sm:$0xff]  ;;  %v568_v3 = vld [vmem:[#allocation12] sm:$0xff]  ;;  %v1189_v4 = vld [vmem:[#allocation10] ss:$0 sm:$0xff] }
  0xfa   :  { %1387 = vmatprep.mubr.msk.f32.mxu0 %vm1917_vm0, %v1918_v1  ;;  %1453 = vmatpush3.bf16.msra.mxu0 %v1452_v15  ;;  %v653_v10 = vld [vmem:[#allocation15] sm:$0xff]  ;;  %v1190_v11 = vld [vmem:[#allocation13] ss:$0 sm:$0xff]  ;;  %v737_v18 = vld [vmem:[%s2368_s14] sm:$0xff] }
  0xfb   :  { %1454 = vmatprep.subr.bf16.mxu0 %v1916_v0  ;;  %v1590_v19 = vld [vmem:[%s2371_s17 + $0x4] ss:$8 sps:$4 sm:$0xff]   ;;  %v1592_v26 = vld [vmem:[%s2371_s17] ss:$8 sps:$4 sm:$0xff]   ;;  %v1593_v27 = vld [vmem:[%s2371_s17 + $0x14] ss:$8 sps:$4 sm:$0xff]  }
  0xfc   :  { %v1595_v29 = vld [vmem:[%s2371_s17 + $0x10] ss:$8 sps:$4 sm:$0xff]   ;;  %v1596_v30 = vld [vmem:[%s2371_s17 + $0x24] ss:$8 sps:$4 sm:$0xff]   ;;  %v1598_v31 = vld [vmem:[%s2371_s17 + $0x20] ss:$8 sps:$4 sm:$0xff]  }
  0xfd   :  { %v1601_v33 = vld [vmem:[%s2371_s17 + $0x30] ss:$8 sps:$4 sm:$0xff]   ;;  %v1604_v35 = vld [vmem:[%s2371_s17 + $0x40] ss:$8 sps:$4 sm:$0xff]   ;;  %v1605_v36 = vld [vmem:[%s2371_s17 + $0x54] ss:$8 sps:$4 sm:$0xff]  }
  0xfe   :  { %1456 = vmatpush3.bf16.msra.mxu0 %v1455_v17  ;;  %v738_v17 = vld [vmem:[%s2368_s14 + $0x8] sm:$0xff]  ;;  %v1613_v41 = vld [vmem:[%s2371_s17 + $0x70] ss:$8 sps:$4 sm:$0xff]   ;;  %v1095_v42 = vld [vmem:[%s2370_s16] sm:$0xff] }
  0xff   :  { %1457 = vmatprep.subr.bf16.mxu0 %v1916_v0  ;;  %v1608_v38 = vld [vmem:[%s2371_s17 + $0x64] ss:$8 sps:$4 sm:$0xff]   ;;  %v1610_v39 = vld [vmem:[%s2371_s17 + $0x60] ss:$8 sps:$4 sm:$0xff]   ;;  %v1275_v56 = vld [vmem:[#allocation19 + $0x70] sm:$0xff]  }
 0x100   :  { %v839_v44 = vld [vmem:[%s2385_s21] sm:$0x3]  ;;  %v1267_v57 = vld [vmem:[#allocation19 + $0x30] sm:$0xff]  }
 0x101   :  { %v1269_v47 = vld [vmem:[#allocation19 + $0x40] sm:$0xff]  }
 0x102   :  { %1459 = vmatpush3.bf16.msra.mxu0 %v1458_v20  ;;  %v1192_v20 = vld [vmem:[#allocation16] ss:$0 sm:$0xff]  ;;  %v1199_v48 = vld [vmem:[#allocation19] sm:$0xff]  }
 0x103   :  { %1460 = vmatprep.subr.bf16.mxu0 %v1916_v0 }
 0x106   :  { %1462 = vmatpush3.bf16.msra.mxu0 %v1461_v28 }
 0x107   :  { %1425 = vmatprep.subr.mxu0 %v1918_v1 }
 0x1cc   :  { %v285_v22 = vpop.f32.mrb[0].mxu0 }
 0x1cd   :  { %v2210_v23 = vadd.f32 %v1183_v21, %v285_v22  ;;  %v1359_v24 = vpop.f32.mrb[1].mxu0 }
 0x1cf   :  { %302 = vrot.lane.b32.xlu0 %v2210_v23, %s1919_s4 }
 0x241   :  { %v303_v25 = vpop.permute.xlu0 %302 }
 0x242   :  { %1369 = vmatmul.mubr.msk.f32.vlgmr.msra.gmra.mrb[0].mxu1 %vm304_vm2, %v303_v25 }
 0x243   :  { %1422 = vmatprep.mubr.msk.f32.mxu1 %vm1917_vm0, %v1918_v1  ;;  %1465 = vmatpush3.bf16.msra.mxu1 %v1464_v32  ;;  %v1599_v32 = vld [vmem:[%s2371_s17 + $0x34] ss:$8 sps:$4 sm:$0xff]  }
 0x244   :  { %1466 = vmatprep.subr.bf16.mxu1 %v1916_v0 }
 0x247   :  { %1468 = vmatpush3.bf16.msra.mxu1 %v1467_v34  ;;  %v1602_v34 = vld [vmem:[%s2371_s17 + $0x44] ss:$8 sps:$4 sm:$0xff]  }
 0x248   :  { %1469 = vmatprep.subr.bf16.mxu1 %v1916_v0 }
 0x24b   :  { %1471 = vmatpush3.bf16.msra.mxu1 %v1470_v37  ;;  %v1607_v37 = vld [vmem:[%s2371_s17 + $0x50] ss:$8 sps:$4 sm:$0xff]  }
 0x24c   :  { %1472 = vmatprep.subr.bf16.mxu1 %v1916_v0 }
 0x24f   :  { %1474 = vmatpush3.bf16.msra.mxu1 %v1473_v40  ;;  %v1611_v40 = vld [vmem:[%s2371_s17 + $0x74] ss:$8 sps:$4 sm:$0xff]  }
 0x250   :  { %1475 = vmatprep.subr.bf16.mxu1 %v1916_v0 }
 0x253   :  { %1477 = vmatpush3.bf16.msra.mxu1 %v1476_v43  ;;  %v1096_v43 = vld [vmem:[%s2370_s16 + $0x8] sm:$0xff] }
 0x254   :  { %1478 = vmatprep.subr.bf16.mxu1 %v1916_v0  ;;  %v1552_v45 = vpack.c.bf16 %v1096_v43, %v1095_v42 }
 0x257   :  { %1480 = vmatpush3.bf16.msra.mxu1 %v1479_v46  ;;  %v289_v46 = vmul.f32 %v2210_v23, %v2210_v23  ;;  %v1265_v23 = vld [vmem:[#allocation19 + $0x20] sm:$0xff]  }
 0x258   :  { %1481 = vmatprep.subr.bf16.mxu1 %v1916_v0 }
 0x25b   :  { %1483 = vmatpush3.bf16.msra.mxu1 %v1482_v49  ;;  %v1270_v49 = vld [vmem:[#allocation19 + $0x48] sm:$0xff]  }
 0x25c   :  { %1484 = vmatprep.subr.bf16.mxu1 %v1916_v0 }
 0x25f   :  { %1486 = vmatpush3.bf16.msra.mxu1 %v1485_v58  ;;  %v1276_v58 = vld [vmem:[#allocation19 + $0x78] sm:$0xff]  }
 0x260   :  { %1520 = vmatprep.subr.bf16.mxu1 %v1269_v47 }
 0x315   :  { %v373_v51 = vpop.f32.mrb[0].mxu1 }
 0x316   :  { %v374_v52 = vadd.f32 %v1185_v50, %v373_v51  ;;  %v1370_v53 = vpop.f32.mrb[1].mxu1  ;;  %v1262_v50 = vld [vmem:[#allocation19 + $0x8] sm:$0xff]   ;;  %v1271_v51 = vld [vmem:[#allocation19 + $0x50] sm:$0xff]  }
 0x317   :  { %v1273_v53 = vld [vmem:[#allocation19 + $0x60] sm:$0xff]  }
 0x318   :  { %vm377_vm3 = vcmp.gt.f32.partialorder %v374_v52, 0.0  ;;  %v378_v54 = vmul.f32 0.2, %v374_v52 }
 0x31a   :  { %v379_v55 = vsel %vm377_vm3, %v374_v52, %v378_v54  ;;  %v1272_v52 = vld [vmem:[#allocation19 + $0x58] sm:$0xff]   ;;  %v1274_v54 = vld [vmem:[#allocation19 + $0x68] sm:$0xff]  }
 0x31b   :  { %1388 = vmatmul.mubr.msk.f32.vlgmr.msra.gmra.mrb[2].mxu0 %vm395_vm4, %v379_v55  ;;  %v1266_v55 = vld [vmem:[#allocation19 + $0x28] sm:$0xff]  }
 0x31c   :  { %1427 = vmatprep.mubr.msk.f32.mxu0 %vm1917_vm0, %v1918_v1  ;;  %1426 = vmatpush3.msra.mxu0 %v568_v3 }
 0x31d   :  { %1430 = vmatprep.subr.mxu0 %v1918_v1 }
 0x3ee   :  { %v465_v60 = vpop.f32.mrb[2].mxu0 }
 0x3ef   :  { %v466_v61 = vadd.f32 %v1187_v59, %v465_v60  ;;  %v1389_v62 = vpop.f32.mrb[3].mxu0  ;;  %v1268_v59 = vld [vmem:[#allocation19 + $0x38] sm:$0xff]   ;;  %v741_v60 = vlaneseq }
 0x3f1   :  { %vm469_vm5 = vcmp.gt.f32.partialorder %v466_v61, 0.0  ;;  %v470_v63 = vmul.f32 0.2, %v466_v61 }
 0x3f3   :  { %v471_v2 = vsel %vm469_vm5, %v466_v61, %v470_v63  ;;  %v742_v61 = vshrl.u32 %v741_v60, 7  ;;  %v739_v63 = vld [vmem:[#allocation18] sm:$0x3] }
 0x3f4   :  { %1423 = vmatmul.mubr.f32.vlgmr.msra.gmra.mrb[2].mxu1 %v471_v2 }
 0x3f5   :  { %1522 = vmatpush3.bf16.msra.mxu1 %v1199_v48  ;;  %v743_v62 = vsub.s32 0, %v742_v61  ;;  %v747_v2 = vsub.s32 1, %v742_v61 }
 0x3f6   :  { %1524 = vmatprep.subr.bf16.mxu1 %v1270_v49 }
 0x3f7   :  { %v744_v3 = vrot.slane %v739_v63, %v743_v62 }
 0x3f9   :  { %1526 = vmatpush3.bf16.msra.mxu1 %v1262_v50 }
 0x3fa   :  { %1528 = vmatprep.subr.bf16.mxu1 %v1271_v51 }
 0x4c7   :  { %v561_v5 = vpop.f32.mrb[2].mxu1 }
 0x4c8   :  { %v562_v6 = vadd.f32 %v1189_v4, %v561_v5  ;;  %v1424_v7 = vpop.f32.mrb[3].mxu1  ;;  %v748_v4 = vrot.slane %v739_v63, %v747_v2 }
 0x4ca   :  { %vm565_vm6 = vcmp.gt.f32.partialorder %v562_v6, 0.0  ;;  %v566_v8 = vmul.f32 0.2, %v562_v6 }
 0x4cc   :  { %v567_v9 = vsel %vm565_vm6, %v562_v6, %v566_v8 }
 0x4cd   :  { %1428 = vmatmul.mubr.msk.f32.vlgmr.msra.gmra.mrb[4].mxu0 %vm576_vm7, %v567_v9 }
 0x4ce   :  { %1432 = vmatprep.mubr.msk.f32.mxu0 %vm1917_vm0, %v1918_v1  ;;  %1431 = vmatpush3.msra.mxu0 %v653_v10 }
 0x4cf   :  { %754 = vmatprep.subr.mxu0 %v738_v17 }
 0x5a0   :  { %v646_v12 = vpop.f32.mrb[4].mxu0 }
 0x5a1   :  { %v647_v13 = vadd.f32 %v1190_v11, %v646_v12  ;;  %v1429_v14 = vpop.f32.mrb[5].mxu0 }
 0x5a3   :  { %vm650_vm8 = vcmp.gt.f32.partialorder %v647_v13, 0.0  ;;  %v651_v15 = vmul.f32 0.2, %v647_v13 }
 0x5a5   :  { %v652_v16 = vsel %vm650_vm8, %v647_v13, %v651_v15 }
 0x5a6   :  { %1433 = vmatmul.mubr.msk.f32.vlgmr.msra.gmra.mrb[6].mxu0 %vm576_vm7, %v652_v16 }
 0x5a7   :  { %818 = vmatprep.mubr.f32.mxu0 %v1918_v1  ;;  %755 = vmatpush1.msra.mxu0 %v737_v18 }
 0x5a8   :  { %1488 = vmatprep.subr.bf16.mxu0 %v1590_v19 }
 0x679   :  { %v730_v21 = vpop.f32.mrb[6].mxu0 }
 0x67a   :  { %v731_v22 = vadd.f32 %v1192_v20, %v730_v21  ;;  %v1434_v24 = vpop.f32.mrb[7].mxu0 }
 0x67c   :  { %vm734_vm9 = vcmp.gt.f32.partialorder %v731_v22, 0.0  ;;  %v735_v25 = vmul.f32 0.2, %v731_v22 }
 0x67e   :  { %v736_v28 = vsel %vm734_vm9, %v731_v22, %v735_v25 }
 0x67f   :  { %1194 = vmatmul.mubr.msk.f32.vlgmr.msra.gmra.mrb[8].mxu0 %vm576_vm7, %v736_v28 }
 0x680   :  { %1490 = vmatpush1.bf16.msra.mxu0 %v1592_v26  ;;  %952 = vmatprep.mubr.f32.mxu0 %v1918_v1 }
 0x681   :  { %1492 = vmatprep.subr.bf16.mxu0 %v1593_v27 }
 0x684   :  { %1494 = vmatpush1.bf16.msra.mxu0 %v1595_v29 }
 0x685   :  { %1496 = vmatprep.subr.bf16.mxu0 %v1596_v30 }
 0x688   :  { %1498 = vmatpush1.bf16.msra.mxu0 %v1598_v31 }
 0x689   :  { %1500 = vmatprep.subr.bf16.mxu0 %v1599_v32 }
 0x68c   :  { %1502 = vmatpush1.bf16.msra.mxu0 %v1601_v33 }
 0x68d   :  { %1504 = vmatprep.subr.bf16.mxu0 %v1602_v34 }
 0x690   :  { %1506 = vmatpush1.bf16.msra.mxu0 %v1604_v35 }
 0x691   :  { %1508 = vmatprep.subr.bf16.mxu0 %v1605_v36 }
 0x694   :  { %1510 = vmatpush1.bf16.msra.mxu0 %v1607_v37 }
 0x695   :  { %1512 = vmatprep.subr.bf16.mxu0 %v1608_v38 }
 0x698   :  { %1514 = vmatpush1.bf16.msra.mxu0 %v1610_v39 }
 0x699   :  { %1516 = vmatprep.subr.bf16.mxu0 %v1611_v40 }
 0x69c   :  { %1518 = vmatpush1.bf16.msra.mxu0 %v1613_v41 }
 0x69d   :  { %1551 = vmatprep.subr.bf16.mxu0 %v1916_v0  ;;  %v1263_v0 = vld [vmem:[#allocation19 + $0x10] sm:$0xff]  }
 0x69e   :  { %1530 = vmatpush3.bf16.msra.mxu1 %v1263_v0 }
 0x69f   :  { %953 = vmatmul.mubr.f32.vlgmr.msra.gmra.mrb[10].mxu0 %v839_v44  ;;  %1532 = vmatprep.subr.bf16.mxu1 %v1272_v52 }
 0x6a0   :  { %1553 = vmatpush3.bf16.msra.mxu0 %v1552_v45  ;;  %1439 = vmatprep.mubr.msk.f32.mxu0 %vm1917_vm0, %v1918_v1  ;;  %v1264_v1 = vld [vmem:[#allocation19 + $0x18] sm:$0xff]  }
 0x6a2   :  { %1534 = vmatpush3.bf16.msra.mxu1 %v1264_v1 }
 0x6a3   :  { %1440 = vmatmul.mubr.msk.f32.vlgmr.msra.gmra.mrb[12].mxu0 %vm215_vm1, %v289_v46  ;;  %1536 = vmatprep.subr.bf16.mxu1 %v1273_v53 }
 0x6a6   :  { %1538 = vmatpush3.bf16.msra.mxu1 %v1265_v23 }
 0x6a7   :  { %1540 = vmatprep.subr.bf16.mxu1 %v1274_v54 }
 0x6aa   :  { %1542 = vmatpush3.bf16.msra.mxu1 %v1266_v55 }
 0x6ab   :  { %1544 = vmatprep.subr.bf16.mxu1 %v1275_v56 }
 0x6ae   :  { %1546 = vmatpush3.bf16.msra.mxu1 %v1267_v57 }
 0x6af   :  { %1548 = vmatprep.subr.bf16.mxu1 %v1276_v58 }
 0x6b2   :  { %1550 = vmatpush3.bf16.msra.mxu1 %v1268_v59 }
 0x752   :  { %v820_v5 = vpop.f32.mrb[8].mxu0 }
 0x753   :  { %v821_v6 = vadd.f32 %v820_v5, %v744_v3  ;;  %v822_v7 = vpop.f32.mrb[9].mxu0 }
 0x754   :  { %v823_v8 = vadd.f32 %v822_v7, %v748_v4 }
 0x755   :  { %v1195_v9 = vmul.f32 -1.442695, %v821_v6 }
 0x756   :  { %v1196_v10 = vmul.f32 -1.442695, %v823_v8 }
 0x757   :  { %1614 = vpow2.f32 %v1195_v9 }
 0x758   :  { %1616 = vpow2.f32 %v1196_v10 }
 0x761   :  { %v1615_v11 = vpop.eup %1614 }
 0x762   :  { %v1617_v12 = vpop.eup %1616  ;;  %v831_v13 = vadd.f32 1.0, %v1615_v11 }
 0x763   :  { %v832_v14 = vadd.f32 1.0, %v1617_v12 }
 0x764   :  { %1618 = vrcp.f32 %v831_v13 }
 0x765   :  { %1620 = vrcp.f32 %v832_v14 }
 0x76e   :  { %v1619_v15 = vpop.eup %1618 }
 0x76f   :  { %v1621_v16 = vpop.eup %1620  ;;  %v837_v17 = vmul.f32 %v1619_v15, %v1619_v15 }
 0x770   :  { %v838_v18 = vmul.f32 %v1621_v16, %v1621_v16 }
 0x772   :  { %v954_v19 = vpop.f32.mrb[10].mxu0 }
 0x773   :  { %v959_v20 = vmul.f32 %v954_v19, %v837_v17  ;;  %v956_v21 = vpop.f32.mrb[11].mxu0 }
 0x774   :  { %v960_v22 = vmul.f32 %v956_v21, %v838_v18 }
 0x776   :  { %1089 = vmatprep.mubr.f32.mxu1 %v960_v22  ;;  %v1166_v24 = vpop.f32.mrb[12].mxu0 }
 0x777   :  { %1090 = vmatmul.mubr.f32.vlgmr.msra.gmra.mrb[4].mxu1 %v959_v20  ;;  %v1441_v25 = vpop.f32.mrb[13].mxu0 }
 0x84a   :  { %v1347_v26 = vpop.f32.mrb[4].mxu1 }
 0x84b   :  { %v1348_v27 = vpop.f32.mrb[5].mxu1 }
 0x84c   :  { %v1349_v28 = vadd.f32 %v1348_v27, %v1347_v26 }
 0x84e   :  { %v1170_v29 = vmul.f32 %v1349_v28, %v1166_v24 }
 0x850   :  { %1171 = vst [vmem:[%s2386_s9] sm:$0x3] %v1170_v29 }
 0x851   :  { %1176 = vsyncpa [#allocation3], 1 }
 0x852   :  { %1177 = vsyncpa [#allocation5], 1 }
 0x853   :  { %1178 = vsyncpa [#allocation8], 1 }
 0x854   :  { %1179 = vsyncpa [#allocation11], 1 }
 0x855   :  { %1180 = vsyncpa [#allocation14], 1 }
 0x856   :  { %1181 = vsyncpa [#allocation17], 1 }
 0x857   :  { %1182 = vsyncpa [#allocation20], 1 }

</bundles_post_ra>
